<compile_context>
chip_gen: v7x
topology: tpu7x:2x2x1
jax: 0.10.0
libtpu: 0.0.40
codegen_flags: <defaults>
</compile_context>

<pallas_src>
import jax
import jax.numpy as jnp
from jax import lax
from jax.experimental import pallas as pl
from jax.experimental.pallas import tpu as pltpu

TEMPERATURE = 0.07
BASE_TEMPERATURE = 0.07
_LANES = 128


def _round_up(x, m):
    return ((x + m - 1) // m) * m


def _pick_tiles(m_real):
    # Row tile: 128 keeps >=2 row tiles for megacore sharding on modest M and
    # suits v5e (1 vst slot); 256 for large M (v6e/v7x) halves grid steps and
    # the re-fetched k stream.
    tm = 256 if m_real > 1024 else 128
    # Column (reduction) tile: as large as reasonable; keep it a multiple of tm
    # so the tk-padded feature array is also aligned for the tm row blocks.
    tk = min(512, _round_up(max(m_real, 1), 128))
    tk = max(tm, (tk // tm) * tm)
    return tm, tk


def _make_supcon_kernel(m_real, tm, tk, lanes, inv_t, neg_scale):
    # For L2-normalized features, max_j sim_scaled[i, j] == 1/T (the diagonal),
    # and log-prob is shift-invariant, so a constant shift of 1/T is exact.
    shift = inv_t

    def kernel(q_ref, k_ref, rlab_ref, clab_ref, out_ref, acc_ref):
        ri = pl.program_id(0)
        ci = pl.program_id(1)

        @pl.when(ci == 0)
        def _init():
            acc_ref[...] = jnp.zeros_like(acc_ref)

        # Raw cosine similarities; contract the feature dim of BOTH operands so
        # the MXU consumes the "transposed" operand directly (no XLU transpose).
        # Operands are bf16 (or f32 for the parity test); accumulate in f32.
        sim = lax.dot_general(
            q_ref[...], k_ref[...],
            dimension_numbers=(((1,), (1,)), ((), ())),
            preferred_element_type=jnp.float32)                      # [tm, tk]

        # Masks rebuilt in-kernel (no [M, M] HBM/VMEM masks, no float casts).
        row_ids = ri * tm + lax.broadcasted_iota(jnp.int32, (tm, tk), 0)
        col_ids = ci * tk + lax.broadcasted_iota(jnp.int32, (tm, tk), 1)
        lmask = jnp.logical_and(col_ids < m_real, row_ids != col_ids)
        same = rlab_ref[...] == clab_ref[...]                        # (tm,1)==(1,tk)
        pmask = jnp.logical_and(same, lmask)   # padded rows handled at finalize

        # Constant-shift softmax numerator: exp(sim/T - 1/T) == exp((sim-1)/T).
        e = jnp.where(lmask, jnp.exp((sim - 1.0) * inv_t), 0.0)

        # Merged per-row accumulators: lane 0 = sum(exp), lane 1 = sum(mask*sim_raw),
        # lane 2 = sum(mask).  sim kept unscaled here; 1/T applied at finalize.
        acc_ref[:, 0:1] += jnp.sum(e, axis=1, keepdims=True)
        acc_ref[:, 1:2] += jnp.sum(jnp.where(pmask, sim, 0.0), axis=1, keepdims=True)
        acc_ref[:, 2:3] += jnp.sum(jnp.where(pmask, 1.0, 0.0), axis=1, keepdims=True)

        @pl.when(ci == pl.num_programs(1) - 1)
        def _finalize():
            l_sum = acc_ref[:, 0:1]
            s_sum = acc_ref[:, 1:2]
            npos = acc_ref[:, 2:3]
            denom = jnp.where(npos < 1e-6, 1.0, npos)
            log_z = shift + jnp.log(l_sum)        # row_max + log(sum exp shifted)
            mean_lpp = (inv_t * s_sum - npos * log_z) / denom
            loss_row = neg_scale * mean_lpp                           # [tm, 1]
            rvalid = (ri * tm + lax.broadcasted_iota(jnp.int32, (tm, 1), 0)) < m_real
            loss_row = jnp.where(rvalid, loss_row, 0.0)
            # Lane-dense output: full (tm, 128) vst, no masked partial stores.
            out_ref[...] = jnp.broadcast_to(loss_row, (tm, lanes))

    return kernel


def supcon_loss_pallas(features, labels, compute_dtype=jnp.bfloat16):
    """features: [B, V, D], labels: [B] int -> scalar loss (SupConLoss, mode='all')."""
    B, V, D = features.shape
    M = B * V

    # --- glue (plain JAX): normalize in f32, view-major concat, pad ---
    feat = features.astype(jnp.float32)
    norm = jnp.sqrt(jnp.sum(feat * feat, axis=-1, keepdims=True))
    feat_n = feat / jnp.maximum(norm, 1e-12)
    # torch.cat(torch.unbind(features, 1), 0): row v*B + b = features[b, v]
    cf = jnp.transpose(feat_n, (1, 0, 2)).reshape(M, D)

    tm, tk = _pick_tiles(M)
    dp = _round_up(D, 128)
    mp = _round_up(M, tk)          # feature/label row & col padding (tk % tm == 0)
    mo = _round_up(M, tm)          # output rows = grid_rows * tm

    cf_p = jnp.zeros((mp, dp), compute_dtype).at[:M, :D].set(cf.astype(compute_dtype))

    full_labels = jnp.tile(labels.astype(jnp.int32).reshape(-1), V)   # [M]
    lab_p = jnp.zeros((mp,), jnp.int32).at[:M].set(full_labels)
    row_lab = lab_p.reshape(mp, 1)
    col_lab = lab_p.reshape(1, mp)

    inv_t = 1.0 / TEMPERATURE
    neg_scale = -(TEMPERATURE / BASE_TEMPERATURE)
    kernel = _make_supcon_kernel(M, tm, tk, _LANES, inv_t, neg_scale)

    out = pl.pallas_call(
        kernel,
        out_shape=jax.ShapeDtypeStruct((mo, _LANES), jnp.float32),
        grid_spec=pltpu.PrefetchScalarGridSpec(
            num_scalar_prefetch=0,
            grid=(pl.cdiv(M, tm), pl.cdiv(M, tk)),   # cdiv: skip all-padding tiles
            in_specs=[
                pl.BlockSpec((tm, dp), lambda ri, ci: (ri, 0)),   # anchor rows
                pl.BlockSpec((tk, dp), lambda ri, ci: (ci, 0)),   # contrast cols
                pl.BlockSpec((tm, 1), lambda ri, ci: (ri, 0)),    # row labels
                pl.BlockSpec((1, tk), lambda ri, ci: (0, ci)),    # col labels
            ],
            out_specs=pl.BlockSpec((tm, _LANES), lambda ri, ci: (ri, 0)),
            # merged accumulators: [exp-sum | sum(mask*sim_raw) | sum(mask)]
            scratch_shapes=[pltpu.VMEM((tm, _LANES), jnp.float32)],
        ),
        compiler_params=pltpu.CompilerParams(
            dimension_semantics=("parallel", "arbitrary"),
            # Tile footprint is a few MiB; 32 MiB is safe on every generation
            # (v5e/v6e 128 MiB, v7x 64 MiB physical).
            vmem_limit_bytes=32 * 1024 * 1024,
        ),
    )(cf_p, cf_p, row_lab, col_lab)

    per_row_loss = out[:M, 0]
    return jnp.sum(per_row_loss) / M


def cross_view_consistency(agent_features, labels, batch_size, world_size=1):
    # world_size == 1: no GatherLayer / all-gather needed.
    # TODO(synk): multi-device GatherLayer (world_size > 1) would need a
    # jax.lax.all_gather of features/labels outside the kernel.
    assert world_size == 1
    return supcon_loss_pallas(agent_features, labels)


def _reference_loss(features, labels):
    """Pure-JAX reference mirroring the PyTorch SupConLoss forward (mode='all')."""
    B, V, D = features.shape
    M = B * V
    norm = jnp.linalg.norm(features, axis=-1, keepdims=True)
    feat_n = features / jnp.maximum(norm, 1e-12)
    cf = jnp.transpose(feat_n, (1, 0, 2)).reshape(M, D)
    sim = (cf @ cf.T) / TEMPERATURE
    logits = sim - jnp.max(sim, axis=1, keepdims=True)
    lbl = labels.reshape(-1, 1)
    mask = jnp.tile((lbl == lbl.T).astype(jnp.float32), (V, V))
    lmask = 1.0 - jnp.eye(M, dtype=jnp.float32)
    mask = mask * lmask
    exp_logits = jnp.exp(logits) * lmask
    log_prob = logits - jnp.log(jnp.sum(exp_logits, axis=1, keepdims=True))
    pos = jnp.sum(mask, axis=1)
    pos = jnp.where(pos < 1e-6, 1.0, pos)
    mean_lpp = jnp.sum(mask * log_prob, axis=1) / pos
    return jnp.mean(-(TEMPERATURE / BASE_TEMPERATURE) * mean_lpp)


if __name__ == "__main__":
    key = jax.random.PRNGKey(0)
    batch_size, n_views, dim = 8, 2, 32
    k1, k2 = jax.random.split(key)
    agent_features = jax.random.normal(k1, (batch_size, n_views, dim), dtype=jnp.float32)
    labels = jax.random.randint(k2, (batch_size,), 0, 3, dtype=jnp.int32)

    ref = jax.block_until_ready(_reference_loss(agent_features, labels))

    # Strict algorithmic parity with the f32 compute path.
    loss_f32 = jax.block_until_ready(
        supcon_loss_pallas(agent_features, labels, compute_dtype=jnp.float32))
    assert jnp.allclose(loss_f32, ref, rtol=1e-4, atol=1e-4), (loss_f32, ref)

    # Default fast path: bf16 MXU operands, f32 accumulate (looser tolerance).
    loss = jax.block_until_ready(
        cross_view_consistency(agent_features, labels, batch_size, world_size=1))
    assert jnp.allclose(loss, ref, rtol=5e-2, atol=5e-2), (loss, ref)

    print("KERNEL_OK")
</pallas_src>

<mosaic_0001>
module attributes {stable_mosaic.version = 11 : i64} {
  func.func @kernel(%arg0: i32, %arg1: i32, %arg2: memref<128x128xf32, #tpu.memory_space<vmem>>, %arg3: memref<128x128xf32, #tpu.memory_space<vmem>>, %arg4: memref<128x1xi32, #tpu.memory_space<vmem>>, %arg5: memref<1x128xi32, #tpu.memory_space<vmem>>, %arg6: memref<128x128xf32, #tpu.memory_space<vmem>>, %arg7: memref<128x128xf32, #tpu.memory_space<vmem>>) attributes {dimension_semantics = [#tpu.dimension_semantics<parallel>, #tpu.dimension_semantics<arbitrary>], iteration_bounds = array<i64: 1, 1>, scalar_prefetch = 0 : i64, scratch_operands = 1 : i64, tpu.core_type = #tpu.core_type<tc>, window_params = [{transform_indices = @transform_0, window_bounds = array<i64: 128, 128>}, {transform_indices = @transform_1, window_bounds = array<i64: 128, 128>}, {transform_indices = @transform_2, window_bounds = array<i64: 128, 1>}, {transform_indices = @transform_3, window_bounds = array<i64: 1, 128>}, {transform_indices = @transform_4, window_bounds = array<i64: 128, 128>}]} {
    %c0_i32 = arith.constant 0 : i32
    %0 = arith.cmpi eq, %arg1, %c0_i32 : i32
    %1 = arith.extui %0 : i1 to i32
    %c0_i32_0 = arith.constant 0 : i32
    %2 = arith.cmpi ne, %1, %c0_i32_0 : i32
    scf.if %2 {
      %cst_30 = arith.constant 0.000000e+00 : f32
      %54 = vector.broadcast %cst_30 : f32 to vector<128x128xf32>
      %c0_31 = arith.constant 0 : index
      %c0_32 = arith.constant 0 : index
      %55 = vector.load %arg7[%c0_31, %c0_32] : memref<128x128xf32, #tpu.memory_space<vmem>>, vector<128x128xf32>
      tpu.vector_store %arg7[%c0_31, %c0_32], %54 {strides = array<i32>} : memref<128x128xf32, #tpu.memory_space<vmem>>, vector<128x128xf32>,
    } else {
    }
    %c0 = arith.constant 0 : index
    %c0_1 = arith.constant 0 : index
    %3 = vector.load %arg2[%c0, %c0_1] : memref<128x128xf32, #tpu.memory_space<vmem>>, vector<128x128xf32>
    %c0_2 = arith.constant 0 : index
    %c0_3 = arith.constant 0 : index
    %4 = vector.load %arg3[%c0_2, %c0_3] : memref<128x128xf32, #tpu.memory_space<vmem>>, vector<128x128xf32>
    %cst = arith.constant dense<0.000000e+00> : vector<128x128xf32>
    %5 = tpu.matmul %3, %4, %cst {dimension_numbers = #tpu.dot_dimension_numbers<[1], [1], [0], [0], [0, 0, 1, 0], [], []>} : vector<128x128xf32>, vector<128x128xf32>, vector<128x128xf32> -> vector<128x128xf32>
    %c128_i32 = arith.constant 128 : i32
    %6 = arith.muli %arg0, %c128_i32 : i32
    %7 = tpu.iota {dimensions = array<i32: 0>} : vector<128x128xi32>
    %8 = vector.broadcast %6 : i32 to vector<128x128xi32>
    %9 = arith.addi %8, %7 : vector<128x128xi32>
    %c128_i32_4 = arith.constant 128 : i32
    %10 = arith.muli %arg1, %c128_i32_4 : i32
    %11 = tpu.iota {dimensions = array<i32: 1>} : vector<128x128xi32>
    %12 = vector.broadcast %10 : i32 to vector<128x128xi32>
    %13 = arith.addi %12, %11 : vector<128x128xi32>
    %c16_i32 = arith.constant 16 : i32
    %14 = vector.broadcast %c16_i32 : i32 to vector<128x128xi32>
    %15 = arith.cmpi slt, %13, %14 : vector<128x128xi32>
    %16 = arith.cmpi ne, %9, %13 : vector<128x128xi32>
    %17 = arith.andi %15, %16 : vector<128x128xi1>
    %c0_5 = arith.constant 0 : index
    %c0_6 = arith.constant 0 : index
    %18 = vector.load %arg4[%c0_5, %c0_6] : memref<128x1xi32, #tpu.memory_space<vmem>>, vector<128x1xi32>
    %c0_7 = arith.constant 0 : index
    %c0_8 = arith.constant 0 : index
    %19 = vector.load %arg5[%c0_7, %c0_8] : memref<1x128xi32, #tpu.memory_space<vmem>>, vector<1x128xi32>
    %20 = vector.broadcast %18 : vector<128x1xi32> to vector<128x128xi32>
    %21 = vector.broadcast %19 : vector<1x128xi32> to vector<128x128xi32>
    %22 = arith.cmpi eq, %20, %21 : vector<128x128xi32>
    %23 = arith.andi %22, %17 : vector<128x128xi1>
    %cst_9 = arith.constant 1.000000e+00 : f32
    %24 = vector.broadcast %cst_9 : f32 to vector<128x128xf32>
    %25 = arith.subf %5, %24 : vector<128x128xf32>
    %cst_10 = arith.constant 14.2857141 : f32
    %26 = vector.broadcast %cst_10 : f32 to vector<128x128xf32>
    %27 = arith.mulf %25, %26 : vector<128x128xf32>
    %28 = math.exp %27 : vector<128x128xf32>
    %cst_11 = arith.constant 0.000000e+00 : f32
    %29 = vector.broadcast %cst_11 : f32 to vector<128x128xf32>
    %30 = arith.select %17, %28, %29 : vector<128x128xi1>, vector<128x128xf32>
    %c0_12 = arith.constant 0 : index
    %c0_13 = arith.constant 0 : index
    %31 = vector.load %arg7[%c0_12, %c0_13] : memref<128x128xf32, #tpu.memory_space<vmem>>, vector<128x1xf32>
    %cst_14 = arith.constant dense<0.000000e+00> : vector<128xf32>
    %32 = vector.multi_reduction <add>, %30, %cst_14 [1] : vector<128x128xf32> to vector<128xf32>
    %33 = vector.shape_cast %32 : vector<128xf32> to vector<128x1xf32>
    %34 = arith.addf %31, %33 : vector<128x1xf32>
    %c0_15 = arith.constant 0 : index
    %c0_16 = arith.constant 0 : index
    %35 = vector.load %arg7[%c0_15, %c0_16] : memref<128x128xf32, #tpu.memory_space<vmem>>, vector<128x1xf32>
    tpu.vector_store %arg7[%c0_15, %c0_16], %34 {strides = array<i32>} : memref<128x128xf32, #tpu.memory_space<vmem>>, vector<128x1xf32>,
    %c0_17 = arith.constant 0 : index
    %c1 = arith.constant 1 : index
    %36 = vector.load %arg7[%c0_17, %c1] : memref<128x128xf32, #tpu.memory_space<vmem>>, vector<128x1xf32>
    %cst_18 = arith.constant 0.000000e+00 : f32
    %37 = vector.broadcast %cst_18 : f32 to vector<128x128xf32>
    %38 = arith.select %23, %5, %37 : vector<128x128xi1>, vector<128x128xf32>
    %cst_19 = arith.constant dense<0.000000e+00> : vector<128xf32>
    %39 = vector.multi_reduction <add>, %38, %cst_19 [1] : vector<128x128xf32> to vector<128xf32>
    %40 = vector.shape_cast %39 : vector<128xf32> to vector<128x1xf32>
    %41 = arith.addf %36, %40 : vector<128x1xf32>
    %c0_20 = arith.constant 0 : index
    %c1_21 = arith.constant 1 : index
    %42 = vector.load %arg7[%c0_20, %c1_21] : memref<128x128xf32, #tpu.memory_space<vmem>>, vector<128x1xf32>
    tpu.vector_store %arg7[%c0_20, %c1_21], %41 {strides = array<i32>} : memref<128x128xf32, #tpu.memory_space<vmem>>, vector<128x1xf32>,
    %c0_22 = arith.constant 0 : index
    %c2 = arith.constant 2 : index
    %43 = vector.load %arg7[%c0_22, %c2] : memref<128x128xf32, #tpu.memory_space<vmem>>, vector<128x1xf32>
    %cst_23 = arith.constant 1.000000e+00 : f32
    %cst_24 = arith.constant 0.000000e+00 : f32
    %44 = vector.broadcast %cst_23 : f32 to vector<128x128xf32>
    %45 = vector.broadcast %cst_24 : f32 to vector<128x128xf32>
    %46 = arith.select %23, %44, %45 : vector<128x128xi1>, vector<128x128xf32>
    %cst_25 = arith.constant dense<0.000000e+00> : vector<128xf32>
    %47 = vector.multi_reduction <add>, %46, %cst_25 [1] : vector<128x128xf32> to vector<128xf32>
    %48 = vector.shape_cast %47 : vector<128xf32> to vector<128x1xf32>
    %49 = arith.addf %43, %48 : vector<128x1xf32>
    %c0_26 = arith.constant 0 : index
    %c2_27 = arith.constant 2 : index
    %50 = vector.load %arg7[%c0_26, %c2_27] : memref<128x128xf32, #tpu.memory_space<vmem>>, vector<128x1xf32>
    tpu.vector_store %arg7[%c0_26, %c2_27], %49 {strides = array<i32>} : memref<128x128xf32, #tpu.memory_space<vmem>>, vector<128x1xf32>,
    %c0_i32_28 = arith.constant 0 : i32
    %51 = arith.cmpi eq, %arg1, %c0_i32_28 : i32
    %52 = arith.extui %51 : i1 to i32
    %c0_i32_29 = arith.constant 0 : i32
    %53 = arith.cmpi ne, %52, %c0_i32_29 : i32
    scf.if %53 {
      %c0_30 = arith.constant 0 : index
      %c0_31 = arith.constant 0 : index
      %54 = vector.load %arg7[%c0_30, %c0_31] : memref<128x128xf32, #tpu.memory_space<vmem>>, vector<128x1xf32>
      %c0_32 = arith.constant 0 : index
      %c1_33 = arith.constant 1 : index
      %55 = vector.load %arg7[%c0_32, %c1_33] : memref<128x128xf32, #tpu.memory_space<vmem>>, vector<128x1xf32>
      %c0_34 = arith.constant 0 : index
      %c2_35 = arith.constant 2 : index
      %56 = vector.load %arg7[%c0_34, %c2_35] : memref<128x128xf32, #tpu.memory_space<vmem>>, vector<128x1xf32>
      %cst_36 = arith.constant 9.99999997E-7 : f32
      %57 = vector.broadcast %cst_36 : f32 to vector<128x1xf32>
      %58 = arith.cmpf olt, %56, %57 : vector<128x1xf32>
      %cst_37 = arith.constant 1.000000e+00 : f32
      %59 = vector.broadcast %cst_37 : f32 to vector<128x1xf32>
      %60 = arith.select %58, %59, %56 : vector<128x1xi1>, vector<128x1xf32>
      %61 = math.log %54 : vector<128x1xf32>
      %cst_38 = arith.constant 14.2857141 : f32
      %62 = vector.broadcast %cst_38 : f32 to vector<128x1xf32>
      %63 = arith.addf %62, %61 : vector<128x1xf32>
      %cst_39 = arith.constant 14.2857141 : f32
      %64 = vector.broadcast %cst_39 : f32 to vector<128x1xf32>
      %65 = arith.mulf %64, %55 : vector<128x1xf32>
      %66 = arith.mulf %56, %63 : vector<128x1xf32>
      %67 = arith.subf %65, %66 : vector<128x1xf32>
      %68 = arith.divf %67, %60 : vector<128x1xf32>
      %cst_40 = arith.constant -1.000000e+00 : f32
      %69 = vector.broadcast %cst_40 : f32 to vector<128x1xf32>
      %70 = arith.mulf %69, %68 : vector<128x1xf32>
      %c128_i32_41 = arith.constant 128 : i32
      %71 = arith.muli %arg0, %c128_i32_41 : i32
      %72 = tpu.iota {dimensions = array<i32: 0>} : vector<128x1xi32>
      %73 = vector.broadcast %71 : i32 to vector<128x1xi32>
      %74 = arith.addi %73, %72 : vector<128x1xi32>
      %c16_i32_42 = arith.constant 16 : i32
      %75 = vector.broadcast %c16_i32_42 : i32 to vector<128x1xi32>
      %76 = arith.cmpi slt, %74, %75 : vector<128x1xi32>
      %cst_43 = arith.constant 0.000000e+00 : f32
      %77 = vector.broadcast %cst_43 : f32 to vector<128x1xf32>
      %78 = arith.select %76, %70, %77 : vector<128x1xi1>, vector<128x1xf32>
      %79 = vector.shape_cast %78 : vector<128x1xf32> to vector<128x1xf32>
      %80 = vector.broadcast %79 : vector<128x1xf32> to vector<128x128xf32>
      %c0_44 = arith.constant 0 : index
      %c0_45 = arith.constant 0 : index
      %81 = vector.load %arg6[%c0_44, %c0_45] : memref<128x128xf32, #tpu.memory_space<vmem>>, vector<128x128xf32>
      tpu.vector_store %arg6[%c0_44, %c0_45], %80 {strides = array<i32>} : memref<128x128xf32, #tpu.memory_space<vmem>>, vector<128x128xf32>,
    } else {
    }
    return
  }
  func.func @transform_0(%arg0: i32, %arg1: i32) -> (i32, i32) {
    %c0_i32 = arith.constant 0 : i32
    %c0_i32_0 = arith.constant 0 : i32
    return %arg0, %c0_i32 : i32, i32
  }
  func.func @transform_1(%arg0: i32, %arg1: i32) -> (i32, i32) {
    %c0_i32 = arith.constant 0 : i32
    %c0_i32_0 = arith.constant 0 : i32
    return %arg1, %c0_i32 : i32, i32
  }
  func.func @transform_2(%arg0: i32, %arg1: i32) -> (i32, i32) {
    %c0_i32 = arith.constant 0 : i32
    %c0_i32_0 = arith.constant 0 : i32
    return %arg0, %c0_i32 : i32, i32
  }
  func.func @transform_3(%arg0: i32, %arg1: i32) -> (i32, i32) {
    %c0_i32 = arith.constant 0 : i32
    %c0_i32_0 = arith.constant 0 : i32
    return %c0_i32, %arg1 : i32, i32
  }
  func.func @transform_4(%arg0: i32, %arg1: i32) -> (i32, i32) {
    %c0_i32 = arith.constant 0 : i32
    %c0_i32_0 = arith.constant 0 : i32
    return %arg0, %c0_i32 : i32, i32
  }
}

</mosaic_0001>

<bundles_post_ra>
// kernel: tpu_custom_call.1
= control target key start
LH: loop header
LB: loop body
LE: loop exit
PB: predicated region body
PF: predicated region fallthrough
CT: control target
= control target key end

     0   :  { %9 = vsyncpa [#allocation4], 0  ;;  %s2314_s0 = inlined_call_operand.vmem [shape: f32[128,128], index: 0, kind: input, shape index: {}]   ;;  %s2315_s1 = inlined_call_operand.hbm [shape: f32[128,128], index: 1, kind: input, shape index: {}]   ;;  %s2316_s2 = inlined_call_operand.vmem [shape: s32[128,1], index: 2, kind: input, shape index: {}]   ;;  %s2317_s3 = inlined_call_operand.vmem [shape: s32[1,128], index: 3, kind: input, shape index: {}]   ;;  %s2318_s4 = inlined_call_operand.hbm [shape: f32[128,128], index: 4, kind: output, shape index: {}]  }
   0x1   :  { %10 = vsyncpa [#allocation5], 0  ;;  %s1579_s15 = smov [#allocation3]   ;;  %s1531_s19 = scalar_lea.hbm %s2315_s1, 2048 }
   0x2   :  { %s18_s16 = sshll.u32 %s1579_s15, 4  ;;  %p1532_p0 = scmp.ne.s32.totalorder %s2315_s1, %s1531_s19  ;;  %s19_s16 = int_to_ptr.vmem [resolvable:$true] %s18_s16 }
   0x3   :  { %p1535_p1 = scmp.lt.u32.totalorder %s1531_s19, %s2315_s1 }
   0x5   :  { %p1537_p2 = pnand %p1535_p1, %p1532_p0 }
   0x7   :  { %1540 = shalt.err (!%p1537_p2)
}
   0x8   :  { %s1541_s24 = scalar_lea.vmem %s19_s16, 2048  ;;  %p1546_p4 = scmp.lt.s32.totalorder %s19_s16, %s19_s16 }
   0x9   :  { %p1542_p3 = scmp.ne.s32.totalorder %s19_s16, %s1541_s24  ;;  %p1547_p5 = scmp.lt.s32.totalorder %s1541_s24, %s1541_s24 }
   0xb   :  { %p1548_p6 = por %p1547_p5, %p1546_p4 }
   0xd   :  { %p1549_p7 = pnand %p1548_p6, %p1542_p3 }
   0xf   :  { %1552 = shalt.err (!%p1549_p7)
}
  0x10   :  { %s1580_s25 = smov 128   ;;  %s1581_s26 = smov 8  }
  0x11   :  { %24 = dma.hbm_to_vmem [thread:$0]  %s2315_s1, 2048, %s19_s16, [#allocation4], %s1580_s25, %s1580_s25, %s1581_s26  }
  0x12   :  { %1575 = dma.done.wait [#allocation4], 2048  }
  0x13   :  { %1576 = vsyncadd [#allocation4], 4294965248  ;;  %v1582_v0 = vmov 0   ;;  %v68_v1 = vld [vmem:[#allocation3] sm:$0xff]  ;;  %v69_v2 = vld [vmem:[#allocation3 + $0x8] sm:$0xff]  ;;  %v1583_v43 = vmov 0.0   ;;  %v230_v44 = vlaneseq }
  0x14   :  { %1452 = vset.pattern.permute.xlu0 %v1582_v0  ;;  %1453 = vset.pattern.permute.xlu1 %v1582_v0  ;;  %v70_v3 = vld [vmem:[#allocation3 + $0x10] sm:$0xff]  ;;  %v1395_v4 = vpack.c.bf16 %v69_v2, %v68_v1  ;;  %v71_v5 = vld [vmem:[#allocation3 + $0x18] sm:$0xff]  ;;  %v52_v7 = vld [vmem:[%s2314_s0] sm:$0xff]  ;;  %36 = vst [vmem:[#allocation2] sm:$0xff] %v1583_v43  ;;  %v2362_v52 = vmov 0  ;;  %s1585_s14 = smov 2  }
  0x15   :  { %v1399_v6 = vpack.c.bf16 %v71_v5, %v70_v3  ;;  %v72_v8 = vld [vmem:[#allocation3 + $0x20] sm:$0xff]  ;;  %v73_v9 = vld [vmem:[#allocation3 + $0x28] sm:$0xff]  ;;  %1371 = vmatprep.mubr.f32.mxu0 %v52_v7  ;;  %v74_v14 = vld [vmem:[#allocation3 + $0x30] sm:$0xff]  ;;  %37 = vst [vmem:[#allocation2 + $0x8] sm:$0xff] %v1583_v43  ;;  %v1698_v45 = vshrl.u32 %v230_v44, 7  ;;  %v1701_v48 = vand.u32 127, %v230_v44 }
  0x16   :  { %1396 = vmatprep.subr.bf16.mxu0 %v1395_v4  ;;  %1427 = vmatprep.subr.bf16.mxu1 %v1395_v4  ;;  %v302_v10 = vld [vmem:[%s2316_s2] sm:$0xff]  ;;  %v303_v12 = vld [vmem:[%s2316_s2 + $0x8] sm:$0xff]  ;;  %v1403_v13 = vpack.c.bf16 %v73_v9, %v72_v8  ;;  %v75_v15 = vld [vmem:[#allocation3 + $0x38] sm:$0xff]  ;;  %38 = vst [vmem:[#allocation2 + $0x10] sm:$0xff] %v1583_v43  ;;  %s1587_s15 = smov [#allocation6]  }
  0x17   :  { %1398 = vmatpush3.bf16.xpose.msra.mxu0 %v1395_v4  ;;  %1435 = vmatpush3.bf16.xpose.msra.mxu1 %v1395_v4  ;;  %v60_v11 = vld [vmem:[%s2314_s0 + $0x40] sm:$0xff]  ;;  %v1407_v16 = vpack.c.bf16 %v75_v15, %v74_v14  ;;  %v77_v18 = vld [vmem:[#allocation3 + $0x48] sm:$0xff]  ;;  %v78_v20 = vld [vmem:[#allocation3 + $0x50] sm:$0xff]  ;;  %39 = vst [vmem:[#allocation2 + $0x18] sm:$0xff] %v1583_v43  ;;  %v232_v47 = vadd.s32 8, %v1698_v45  ;;  %vm2322_vm0 = vcmp.lt.s32.totalorder %v1701_v48, 16  ;;  %vm270_vm2 = vcmp.ne.s32.totalorder %v1698_v45, %v1701_v48 }
  0x18   :  { %1400 = vmatprep.subr.bf16.mxu0 %v1399_v6  ;;  %1428 = vmatprep.subr.bf16.mxu1 %v1399_v6  ;;  %v76_v17 = vld [vmem:[#allocation3 + $0x40] sm:$0xff]  ;;  %v79_v21 = vld [vmem:[#allocation3 + $0x58] sm:$0xff]  ;;  %v81_v24 = vld [vmem:[#allocation3 + $0x68] sm:$0xff]  ;;  %40 = vst [vmem:[#allocation2 + $0x20] sm:$0xff] %v1583_v43  ;;  %s1278_s16 = sshll.u32 %s1587_s15, 4  ;;  %s1279_s16 = int_to_ptr.vmem [resolvable:$true] %s1278_s16 }
  0x19   :  { %320 = vperm.xlu0 %1452, %v302_v10   ;;  %1383 = vmatprep.mubr.f32.mxu1 %v60_v11  ;;  %v1411_v19 = vpack.c.bf16 %v77_v18, %v76_v17  ;;  %v1415_v22 = vpack.c.bf16 %v79_v21, %v78_v20  ;;  %v80_v23 = vld [vmem:[#allocation3 + $0x60] sm:$0xff]  ;;  %v82_v26 = vld [vmem:[#allocation3 + $0x70] sm:$0xff]  ;;  %v83_v27 = vld [vmem:[#allocation3 + $0x78] sm:$0xff]  ;;  %41 = vst [vmem:[#allocation2 + $0x28] sm:$0xff] %v1583_v43  ;;  %s1553_s17 = scalar_lea.vmem %s1279_s16, 2048  ;;  %p1558_p9 = scmp.lt.s32.totalorder %s1279_s16, %s1279_s16 }
  0x1a   :  { %v1419_v25 = vpack.c.bf16 %v81_v24, %v80_v23  ;;  %v1423_v28 = vpack.c.bf16 %v83_v27, %v82_v26  ;;  %v53_v29 = vld [vmem:[%s2314_s0 + $0x8] sm:$0xff]  ;;  %v54_v31 = vld [vmem:[%s2314_s0 + $0x10] sm:$0xff]  ;;  %v55_v33 = vld [vmem:[%s2314_s0 + $0x18] sm:$0xff]  ;;  %42 = vst [vmem:[#allocation2 + $0x30] sm:$0xff] %v1583_v43  ;;  %vm271_vm1 = vcmp.ne.s32.totalorder %v232_v47, %v1701_v48  ;;  %v237_v26 = vadd.s32 48, %v1698_v45  ;;  %p1554_p8 = scmp.ne.s32.totalorder %s1279_s16, %s1553_s17  ;;  %p1559_p10 = scmp.lt.s32.totalorder %s1553_s17, %s1553_s17 }
  0x1b   :  { %v61_v30 = vld [vmem:[%s2314_s0 + $0x48] sm:$0xff]  ;;  %v62_v32 = vld [vmem:[%s2314_s0 + $0x50] sm:$0xff]  ;;  %v63_v34 = vld [vmem:[%s2314_s0 + $0x58] sm:$0xff]  ;;  %43 = vst [vmem:[#allocation2 + $0x38] sm:$0xff] %v1583_v43 }
  0x1c   :  { %v56_v35 = vld [vmem:[%s2314_s0 + $0x20] sm:$0xff]  ;;  %v57_v37 = vld [vmem:[%s2314_s0 + $0x28] sm:$0xff]  ;;  %v58_v39 = vld [vmem:[%s2314_s0 + $0x30] sm:$0xff]  ;;  %44 = vst [vmem:[#allocation2 + $0x40] sm:$0xff] %v1583_v43  ;;  %vm276_vm9 = vcmp.ne.s32.totalorder %v237_v26, %v1701_v48  ;;  %p1560_p11 = por %p1559_p10, %p1558_p9 }
  0x1d   :  { %323 = vperm.xlu0 %1452, %v303_v12   ;;  %v64_v36 = vld [vmem:[%s2314_s0 + $0x60] sm:$0xff]  ;;  %v65_v38 = vld [vmem:[%s2314_s0 + $0x68] sm:$0xff]  ;;  %v66_v40 = vld [vmem:[%s2314_s0 + $0x70] sm:$0xff]  ;;  %45 = vst [vmem:[#allocation2 + $0x48] sm:$0xff] %v1583_v43 }
  0x1e   :  { %v59_v41 = vld [vmem:[%s2314_s0 + $0x38] sm:$0xff]  ;;  %46 = vst [vmem:[#allocation2 + $0x50] sm:$0xff] %v1583_v43  ;;  %47 = vst [vmem:[#allocation2 + $0x58] sm:$0xff] %v1583_v43  ;;  %v1706_v49 = vld [vmem:[%s2317_s3] ss:$0 sm:$0xff]  ;;  %p1561_p12 = pnand %p1560_p11, %p1554_p8 }
  0x1f   :  { %1402 = vmatpush3.bf16.xpose.msra.mxu0 %v1399_v6  ;;  %1436 = vmatpush3.bf16.xpose.msra.mxu1 %v1399_v6  ;;  %v67_v42 = vld [vmem:[%s2314_s0 + $0x78] sm:$0xff]  ;;  %48 = vst [vmem:[#allocation2 + $0x60] sm:$0xff] %v1583_v43  ;;  %49 = vst [vmem:[#allocation2 + $0x68] sm:$0xff] %v1583_v43  ;;  %v306_v59 = vld [vmem:[%s2316_s2 + $0x20] sm:$0xff] }
  0x20   :  { %1404 = vmatprep.subr.bf16.mxu0 %v1403_v13  ;;  %1429 = vmatprep.subr.bf16.mxu1 %v1403_v13  ;;  %50 = vst [vmem:[#allocation2 + $0x70] sm:$0xff] %v1583_v43  ;;  %51 = vst [vmem:[#allocation2 + $0x78] sm:$0xff] %v1583_v43  ;;  %v304_v62 = vld [vmem:[%s2316_s2 + $0x10] sm:$0xff]  ;;  %v310_v1 = vld [vmem:[%s2316_s2 + $0x40] sm:$0xff] }
  0x21   :  { %vm1715_vm4 = vmand %vm2322_vm0, %vm271_vm1  ;;  %v305_v3 = vld [vmem:[%s2316_s2 + $0x18] sm:$0xff]  ;;  %v312_v5 = vld [vmem:[%s2316_s2 + $0x50] sm:$0xff] }
  0x22   :  { %vm1722_vm6 = vmand %vm2322_vm0, %vm270_vm2  ;;  %v307_v6 = vld [vmem:[%s2316_s2 + $0x28] sm:$0xff]  ;;  %v314_v8 = vld [vmem:[%s2316_s2 + $0x60] sm:$0xff] }
  0x23   :  { %v308_v10 = vld [vmem:[%s2316_s2 + $0x30] sm:$0xff]  ;;  %v309_v14 = vld [vmem:[%s2316_s2 + $0x38] sm:$0xff]  ;;  %v315_v21 = vld [vmem:[%s2316_s2 + $0x68] sm:$0xff] }
  0x24   :  { %v316_v12 = vld [vmem:[%s2316_s2 + $0x70] sm:$0xff]  ;;  %v313_v20 = vld [vmem:[%s2316_s2 + $0x58] sm:$0xff]  ;;  %vm1815_vm10 = vmand %vm2322_vm0, %vm276_vm9 }
  0x27   :  { %1406 = vmatpush3.bf16.xpose.msra.mxu0 %v1403_v13  ;;  %1437 = vmatpush3.bf16.xpose.msra.mxu1 %v1403_v13 }
  0x28   :  { %1408 = vmatprep.subr.bf16.mxu0 %v1407_v16  ;;  %1430 = vmatprep.subr.bf16.mxu1 %v1407_v16 }
  0x2f   :  { %1410 = vmatpush3.bf16.xpose.msra.mxu0 %v1407_v16  ;;  %1438 = vmatpush3.bf16.xpose.msra.mxu1 %v1407_v16 }
  0x30   :  { %1412 = vmatprep.subr.bf16.mxu0 %v1411_v19  ;;  %1431 = vmatprep.subr.bf16.mxu1 %v1411_v19 }
  0x37   :  { %1414 = vmatpush3.bf16.xpose.msra.mxu0 %v1411_v19  ;;  %1439 = vmatpush3.bf16.xpose.msra.mxu1 %v1411_v19  ;;  %v311_v19 = vld [vmem:[%s2316_s2 + $0x48] sm:$0xff] }
  0x38   :  { %1416 = vmatprep.subr.bf16.mxu0 %v1415_v22  ;;  %1432 = vmatprep.subr.bf16.mxu1 %v1415_v22 }
  0x3f   :  { %1418 = vmatpush3.bf16.xpose.msra.mxu0 %v1415_v22  ;;  %1440 = vmatpush3.bf16.xpose.msra.mxu1 %v1415_v22  ;;  %v317_v22 = vld [vmem:[%s2316_s2 + $0x78] sm:$0xff]  ;;  %s1584_s2 = smov 127  }
  0x40   :  { %1420 = vmatprep.subr.bf16.mxu0 %v1419_v25  ;;  %1433 = vmatprep.subr.bf16.mxu1 %v1419_v25 }
  0x47   :  { %1422 = vmatpush3.bf16.xpose.msra.mxu0 %v1419_v25  ;;  %1441 = vmatpush3.bf16.xpose.msra.mxu1 %v1419_v25 }
  0x48   :  { %1424 = vmatprep.subr.bf16.mxu0 %v1423_v28  ;;  %1434 = vmatprep.subr.bf16.mxu1 %v1423_v28 }
  0x4f   :  { %1426 = vmatpush3.bf16.xpose.msra.mxu0 %v1423_v28  ;;  %1442 = vmatpush3.bf16.xpose.msra.mxu1 %v1423_v28 }
  0x56   :  { %1372 = vmatmul.mubr.f32.vlgmr.msra.gmra.mrb[0].mxu0 %v53_v29  ;;  %1384 = vmatmul.mubr.f32.vlgmr.msra.gmra.mrb[0].mxu1 %v61_v30 }
  0x57   :  { %1374 = vmatprep.mubr.f32.mxu0 %v54_v31  ;;  %1386 = vmatprep.mubr.f32.mxu1 %v62_v32 }
  0x5a   :  { %1375 = vmatmul.mubr.f32.gmra.mrb[2].mxu0 %v55_v33  ;;  %1387 = vmatmul.mubr.f32.gmra.mrb[2].mxu1 %v63_v34 }
  0x5b   :  { %1377 = vmatprep.mubr.f32.mxu0 %v56_v35  ;;  %1389 = vmatprep.mubr.f32.mxu1 %v64_v36 }
  0x5e   :  { %1378 = vmatmul.mubr.f32.gmra.mrb[4].mxu0 %v57_v37  ;;  %1390 = vmatmul.mubr.f32.gmra.mrb[4].mxu1 %v65_v38  ;;  %v233_v37 = vadd.s32 16, %v1698_v45 }
  0x5f   :  { %1380 = vmatprep.mubr.f32.mxu0 %v58_v39  ;;  %1392 = vmatprep.mubr.f32.mxu1 %v66_v40 }
  0x60   :  { %vm272_vm11 = vcmp.ne.s32.totalorder %v233_v37, %v1701_v48  ;;  %v2358_v37 = vmov 0 }
  0x61   :  { %vm1840_vm13 = vmand %vm2322_vm0, %vm272_vm11 }
  0x62   :  { %1381 = vmatmul.mubr.f32.gmra.mrb[6].mxu0 %v59_v41  ;;  %1393 = vmatmul.mubr.f32.gmra.mrb[6].mxu1 %v67_v42  ;;  %v235_v41 = vadd.s32 32, %v1698_v45 }
  0x64   :  { %vm274_vm12 = vcmp.ne.s32.totalorder %v235_v41, %v1701_v48  ;;  %v242_v41 = vadd.s32 88, %v1698_v45 }
  0x65   :  { %vm1850_vm2 = vmand %vm2322_vm0, %vm274_vm12 }
  0x98   :  { %v321_v46 = vpop.permute.xlu0 %320 }
  0x99   :  { %vm371_vm5 = vcmp.eq.s32.totalorder %v321_v46, %v1706_v49  ;;  %v234_v46 = vadd.s32 24, %v1698_v45 }
  0x9a   :  { %vm387_vm8 = vmand %vm371_vm5, %vm1722_vm6 }
  0x9b   :  { %v677_v57 = vsel %vm387_vm8, 1.0, %v1583_v43  ;;  %vm273_vm14 = vcmp.ne.s32.totalorder %v234_v46, %v1701_v48  ;;  %v243_v46 = vadd.s32 96, %v1698_v45 }
  0x9c   :  { %v324_v50 = vpop.permute.xlu0 %323  ;;  %vm1866_vm5 = vmand %vm2322_vm0, %vm273_vm14 }
  0x9d   :  { %vm372_vm3 = vcmp.eq.s32.totalorder %v324_v50, %v1706_v49 }
  0x9e   :  { %vm388_vm7 = vmand %vm372_vm3, %vm1715_vm4 }
  0x9f   :  { %v678_v58 = vsel %vm388_vm7, 1.0, %v1583_v43 }
 0x129   :  { %v1726_v53 = vpop.f32.mrb[0].mxu0  ;;  %v1743_v61 = vpop.f32.mrb[0].mxu1 }
 0x12a   :  { %v1730_v54 = vpop.f32.mrb[1].mxu0  ;;  %v581_v55 = vsel %vm388_vm7, %v1726_v53, 0.0  ;;  %v1760_v4 = vpop.f32.mrb[1].mxu1  ;;  %v1292_v30 = vadd.f32 -1.0, %v1726_v53  ;;  %v1300_v32 = vadd.f32 -1.0, %v1743_v61  ;;  %v2340_v53 = vmov 0 }
 0x12b   :  { %598 = vadd.xlane.f32.xlu1 %v581_v55  ;;  %v580_v56 = vsel %vm387_vm8, %v1730_v54, 0.0  ;;  %v1291_v34 = vadd.f32 -1.0, %v1730_v54  ;;  %v2341_v53 = vsel %vm1840_vm13, 4294967295, %v2340_v53  ;;  %v236_v55 = vadd.s32 40, %v1698_v45 }
 0x12c   :  { %596 = vadd.xlane.f32.xlu0 %v580_v56  ;;  %v420_v33 = vmul.f32 14.285714, %v1292_v30  ;;  %v428_v36 = vmul.f32 14.285714, %v1300_v32  ;;  %v2342_v56 = vmov 0 }
 0x12d   :  { %v1741_v60 = vpop.f32.mrb[2].mxu0  ;;  %v1768_v7 = vpop.f32.mrb[2].mxu1  ;;  %v419_v39 = vmul.f32 14.285714, %v1291_v34  ;;  %v2343_v56 = vsel %vm1850_vm2, 4294967295, %v2342_v56  ;;  %vm275_vm8 = vcmp.ne.s32.totalorder %v236_v55, %v1701_v48 }
 0x12e   :  { %v1748_v63 = vpop.f32.mrb[3].mxu0  ;;  %v1773_v9 = vpop.f32.mrb[3].mxu1  ;;  %v437_v38 = vmul.f32 1.442695, %v420_v33  ;;  %v453_v44 = vmul.f32 1.442695, %v428_v36  ;;  %vm1893_vm14 = vmand %vm2322_vm0, %vm275_vm8 }
 0x12f   :  { %693 = vadd.xlane.f32.xlu1 %v677_v57  ;;  %v435_v47 = vmul.f32 1.442695, %v419_v39  ;;  %v241_v36 = vadd.s32 80, %v1698_v45  ;;  %v2360_v39 = vmov 0 }
 0x131   :  { %v1750_v0 = vpop.f32.mrb[4].mxu0  ;;  %v1778_v11 = vpop.f32.mrb[4].mxu1 }
 0x132   :  { %v1755_v2 = vpop.f32.mrb[5].mxu0  ;;  %v1783_v13 = vpop.f32.mrb[5].mxu1 }
 0x133   :  { %695 = vadd.xlane.f32.xlu1 %v678_v58  ;;  %v240_v58 = vadd.s32 72, %v1698_v45 }
 0x135   :  { %v1788_v15 = vpop.f32.mrb[6].mxu0  ;;  %v1792_v17 = vpop.f32.mrb[6].mxu1  ;;  %vm279_vm12 = vcmp.ne.s32.totalorder %v240_v58, %v1701_v48  ;;  %v2366_v58 = vmov 0 }
 0x136   :  { %v1790_v16 = vpop.f32.mrb[7].mxu0  ;;  %v1794_v18 = vpop.f32.mrb[7].mxu1 }
 0x137   :  { %v1297_v23 = vadd.f32 -1.0, %v1790_v16 }
 0x139   :  { %v425_v24 = vmul.f32 14.285714, %v1297_v23 }
 0x13b   :  { %v447_v25 = vmul.f32 1.442695, %v425_v24  ;;  %v239_v24 = vadd.s32 64, %v1698_v45 }
 0x13d   :  { %1491 = vpow2.f32 %v447_v25 }
 0x13e   :  { %1493 = vpow2.f32 %v437_v38 }
 0x13f   :  { %1495 = vpow2.f32 %v453_v44 }
 0x140   :  { %1497 = vpow2.f32 %v435_v47 }
 0x142   :  { %332 = vperm.xlu0 %1452, %v306_v59  }
 0x144   :  { %326 = vperm.xlu1 %1453, %v304_v62   ;;  %v2346_v62 = vmov 0 }
 0x145   :  { %v2347_v62 = vsel %vm1866_vm5, 4294967295, %v2346_v62 }
 0x146   :  { %344 = vperm.xlu0 %1452, %v310_v1  }
 0x147   :  { %v1811_v27 = vpop.eup %1491 }
 0x148   :  { %329 = vperm.xlu1 %1453, %v305_v3   ;;  %v473_v29 = vsel %vm1815_vm10, %v1811_v27, 0.0 }
 0x14a   :  { %350 = vperm.xlu0 %1452, %v312_v5  }
 0x14c   :  { %335 = vperm.xlu1 %1453, %v307_v6  }
 0x14e   :  { %356 = vperm.xlu0 %1452, %v314_v8  }
 0x150   :  { %338 = vperm.xlu1 %1453, %v308_v10   ;;  %v2352_v10 = vmov 0 }
 0x151   :  { %v2353_v10 = vsel %vm1893_vm14, 4294967295, %v2352_v10 }
 0x152   :  { %362 = vperm.xlu0 %1452, %v316_v12   ;;  %v1494_v12 = vpop.eup %1493 }
 0x153   :  { %v468_v26 = vsel %vm1715_vm4, %v1494_v12, 0.0 }
 0x154   :  { %341 = vperm.xlu1 %1453, %v309_v14  }
 0x158   :  { %347 = vperm.xlu1 %1453, %v311_v19  }
 0x15c   :  { %353 = vperm.xlu1 %1453, %v313_v20   ;;  %v238_v20 = vadd.s32 56, %v1698_v45 }
 0x160   :  { %359 = vperm.xlu1 %1453, %v315_v21  }
 0x164   :  { %365 = vperm.xlu1 %1453, %v317_v22   ;;  %v1496_v22 = vpop.eup %1495 }
 0x165   :  { %v1498_v30 = vpop.eup %1497 }
 0x166   :  { %v467_v51 = vsel %vm1722_vm6, %v1498_v30, 0.0 }
 0x1b8   :  { %v1823_v31 = vpop.xlane.xlu1 %598 }
 0x1b9   :  { %v1830_v40 = vpop.xlane.xlu0 %596 }
 0x1bc   :  { %v1827_v35 = vpop.xlane.xlu1 %693 }
 0x1c0   :  { %v1833_v42 = vpop.xlane.xlu1 %695 }
 0x1c1   :  { %v333_v50 = vpop.permute.xlu0 %332 }
 0x1c2   :  { %vm375_vm15 = vcmp.eq.s32.totalorder %v333_v50, %v1706_v49 }
 0x1c3   :  { %vm1872_vm7 = vmand %vm375_vm15, %vm1850_vm2 }
 0x1c4   :  { %v327_v54 = vpop.permute.xlu1 %326  ;;  %v584_v8 = vsel %vm1872_vm7, %v1755_v2, 0.0  ;;  %v681_v5 = vsel %vm1872_vm7, 1.0, %v1583_v43 }
 0x1c5   :  { %vm373_vm1 = vcmp.eq.s32.totalorder %v327_v54, %v1706_v49  ;;  %v345_v14 = vpop.permute.xlu0 %344 }
 0x1c6   :  { %vm1856_vm3 = vmand %vm373_vm1, %vm1840_vm13 }
 0x1c7   :  { %v582_v59 = vsel %vm1856_vm3, %v1748_v63, 0.0  ;;  %vm1901_vm1 = vmand %vm2322_vm0, %vm279_vm12 }
 0x1c8   :  { %v330_v1 = vpop.permute.xlu1 %329  ;;  %600 = vadd.xlane.f32.xlu1 %v582_v59  ;;  %v476_v33 = vsel %vm1901_vm1, %v1496_v22, 0.0  ;;  %v244_v59 = vadd.s32 104, %v1698_v45 }
 0x1c9   :  { %vm374_vm9 = vcmp.eq.s32.totalorder %v330_v1, %v1706_v49  ;;  %v351_v34 = vpop.permute.xlu0 %350  ;;  %v2371_v1 = vmov 0 }
 0x1ca   :  { %vm1880_vm11 = vmand %vm374_vm9, %vm1866_vm5  ;;  %vm277_vm9 = vcmp.ne.s32.totalorder %v238_v20, %v1701_v48  ;;  %v2375_v20 = vmov 0 }
 0x1cb   :  { %v583_v6 = vsel %vm1880_vm11, %v1741_v60, 0.0  ;;  %vm1927_vm4 = vmand %vm2322_vm0, %vm277_vm9 }
 0x1cc   :  { %v336_v19 = vpop.permute.xlu1 %335  ;;  %602 = vadd.xlane.f32.xlu0 %v583_v6  ;;  %604 = vadd.xlane.f32.xlu1 %v584_v8  ;;  %v2359_v37 = vsel %vm1927_vm4, 4294967295, %v2358_v37  ;;  %v245_v6 = vadd.s32 112, %v1698_v45 }
 0x1cd   :  { %vm376_vm15 = vcmp.eq.s32.totalorder %v336_v19, %v1706_v49  ;;  %v357_v54 = vpop.permute.xlu0 %356 }
 0x1ce   :  { %vm1907_vm8 = vmand %vm376_vm15, %vm1893_vm14  ;;  %vm278_vm15 = vcmp.ne.s32.totalorder %v239_v24, %v1701_v48  ;;  %vm379_vm14 = vcmp.eq.s32.totalorder %v345_v14, %v1706_v49  ;;  %v2373_v14 = vmov 0  ;;  %v2379_v24 = vmov 0 }
 0x1cf   :  { %v585_v25 = vsel %vm1907_vm8, %v1750_v0, 0.0  ;;  %vm1942_vm9 = vmand %vm2322_vm0, %vm278_vm15  ;;  %vm381_vm0 = vcmp.eq.s32.totalorder %v351_v34, %v1706_v49 }
 0x1d0   :  { %v339_v32 = vpop.permute.xlu1 %338  ;;  %606 = vadd.xlane.f32.xlu0 %v585_v25  ;;  %501 = vadd.xlane.f32.xlu1 %v468_v26  ;;  %v2363_v52 = vsel %vm1942_vm9, 4294967295, %v2362_v52  ;;  %vm1962_vm15 = vmand %vm379_vm14, %vm1942_vm9  ;;  %vm282_vm9 = vcmp.ne.s32.totalorder %v243_v46, %v1701_v48 }
 0x1d1   :  { %vm377_vm12 = vcmp.eq.s32.totalorder %v339_v32, %v1706_v49  ;;  %v2367_v58 = vsel %vm1962_vm15, 4294967295, %v2366_v58  ;;  %v588_v12 = vsel %vm1962_vm15, %v1760_v4, 0.0  ;;  %vm383_vm15 = vcmp.eq.s32.totalorder %v357_v54, %v1706_v49  ;;  %v363_v22 = vpop.permute.xlu0 %362 }
 0x1d2   :  { %vm1933_vm2 = vmand %vm377_vm12, %vm1815_vm10  ;;  %vm280_vm12 = vcmp.ne.s32.totalorder %v241_v36, %v1701_v48 }
 0x1d3   :  { %v2361_v39 = vsel %vm1933_vm2, 4294967295, %v2360_v39  ;;  %v586_v50 = vsel %vm1933_vm2, %v1790_v16, 0.0  ;;  %v2369_v16 = vmov 0 }
 0x1d4   :  { %v342_v38 = vpop.permute.xlu1 %341  ;;  %517 = vadd.xlane.f32.xlu0 %v476_v33  ;;  %499 = vadd.xlane.f32.xlu1 %v467_v51 }
 0x1d5   :  { %vm378_vm6 = vcmp.eq.s32.totalorder %v342_v38, %v1706_v49 }
 0x1d6   :  { %vm1948_vm13 = vmand %vm378_vm6, %vm1927_vm4  ;;  %vm281_vm6 = vcmp.ne.s32.totalorder %v242_v41, %v1701_v48  ;;  %vm2368_vm4 = vcmp.lt.s32.totalorder %v1701_v48, 16  ;;  %v1299_v41 = vadd.f32 -1.0, %v1760_v4  ;;  %v1302_v4 = vadd.f32 -1.0, %v1768_v7 }
 0x1d7   :  { %v587_v47 = vsel %vm1948_vm13, %v1788_v15, 0.0  ;;  %vm1972_vm5 = vmand %vm2368_vm4, %vm280_vm12  ;;  %v684_v23 = vsel %vm1948_vm13, 1.0, %v1583_v43  ;;  %vm2400_vm13 = vnez %v2367_v58 }
 0x1d8   :  { %v348_v55 = vpop.permute.xlu1 %347  ;;  %610 = vadd.xlane.f32.xlu0 %v587_v47  ;;  %608 = vadd.xlane.f32.xlu1 %v586_v50  ;;  %v2370_v16 = vsel %vm1972_vm5, 4294967295, %v2369_v16  ;;  %vm1992_vm12 = vmand %vm2368_vm4, %vm281_vm6  ;;  %v1294_v50 = vadd.f32 -1.0, %v1741_v60  ;;  %v685_v44 = vsel %vm2400_vm13, 1.0, %v1583_v43  ;;  %vm2408_vm13 = vnez %v2353_v10 }
 0x1d9   :  { %vm380_vm10 = vcmp.eq.s32.totalorder %v348_v55, %v1706_v49  ;;  %v2374_v14 = vsel %vm1992_vm12, 4294967295, %v2373_v14 }
 0x1da   :  { %vm1978_vm14 = vmand %vm380_vm10, %vm1901_vm1  ;;  %vm283_vm1 = vcmp.ne.s32.totalorder %v244_v59, %v1701_v48  ;;  %v427_v59 = vmul.f32 14.285714, %v1299_v41  ;;  %v422_v60 = vmul.f32 14.285714, %v1294_v50 }
 0x1db   :  { %v2372_v1 = vsel %vm1978_vm14, 4294967295, %v2371_v1  ;;  %v589_v8 = vsel %vm1978_vm14, %v1743_v61, 0.0  ;;  %vm1998_vm10 = vmand %vm381_vm0, %vm1972_vm5  ;;  %v246_v61 = vadd.s32 120, %v1698_v45  ;;  %vm284_vm5 = vcmp.ne.s32.totalorder %v245_v6, %v1701_v48 }
 0x1dc   :  { %v354_v19 = vpop.permute.xlu1 %353  ;;  %614 = vadd.xlane.f32.xlu0 %v589_v8  ;;  %612 = vadd.xlane.f32.xlu1 %v588_v12  ;;  %v2376_v20 = vsel %vm1998_vm10, 4294967295, %v2375_v20  ;;  %vm2008_vm14 = vmand %vm2368_vm4, %vm282_vm9  ;;  %v590_v25 = vsel %vm1998_vm10, %v1773_v9, 0.0  ;;  %v430_v6 = vmul.f32 14.285714, %v1302_v4  ;;  %v680_v8 = vsel %vm1880_vm11, 1.0, %v1583_v43 }
 0x1dd   :  { %vm382_vm6 = vcmp.eq.s32.totalorder %v354_v19, %v1706_v49  ;;  %vm2381_vm9 = vmmov %vm2368_vm4  ;;  %v451_v12 = vmul.f32 1.442695, %v427_v59  ;;  %vm2399_vm7 = vnez %v2372_v1 }
 0x1de   :  { %vm2014_vm0 = vmand %vm382_vm6, %vm1992_vm12  ;;  %vm285_vm12 = vcmp.ne.s32.totalorder %v246_v61, %v1701_v48  ;;  %v1303_v61 = vadd.f32 -1.0, %v1783_v13 }
 0x1df   :  { %v2380_v24 = vsel %vm2014_vm0, 4294967295, %v2379_v24  ;;  %v591_v45 = vsel %vm2014_vm0, %v1768_v7, 0.0  ;;  %vm2027_vm4 = vmand %vm2381_vm9, %vm283_vm1  ;;  %vm385_vm0 = vcmp.eq.s32.totalorder %v363_v22, %v1706_v49  ;;  %v679_v7 = vsel %vm1856_vm3, 1.0, %v1583_v43 }
 0x1e0   :  { %v360_v30 = vpop.permute.xlu1 %359  ;;  %618 = vadd.xlane.f32.xlu0 %v591_v45  ;;  %616 = vadd.xlane.f32.xlu1 %v590_v25  ;;  %vm2033_vm6 = vmand %vm383_vm15, %vm2008_vm14  ;;  %v441_v22 = vmul.f32 1.442695, %v422_v60  ;;  %v457_v45 = vmul.f32 1.442695, %v430_v6  ;;  %v682_v25 = vsel %vm1907_vm8, 1.0, %v1583_v43  ;;  %1499 = vpow2.f32 %v451_v12 }
 0x1e1   :  { %vm384_vm10 = vcmp.eq.s32.totalorder %v360_v30, %v1706_v49  ;;  %vm2386_vm1 = vmmov %vm2381_vm9  ;;  %v592_v51 = vsel %vm2033_vm6, %v1783_v13, 0.0  ;;  %v431_v30 = vmul.f32 14.285714, %v1303_v61  ;;  %vm2398_vm3 = vnez %v2361_v39 }
 0x1e2   :  { %vm2042_vm9 = vmand %vm2386_vm1, %vm284_vm5  ;;  %1501 = vpow2.f32 %v441_v22  ;;  %v683_v3 = vsel %vm2398_vm3, 1.0, %v1583_v43  ;;  %vm2401_vm11 = vnez %v2380_v24  ;;  %vm2402_vm8 = vnez %v2376_v20 }
 0x1e3   :  { %vm2048_vm2 = vmand %vm384_vm10, %vm2027_vm4  ;;  %1503 = vpow2.f32 %v457_v45  ;;  %v459_v41 = vmul.f32 1.442695, %v431_v30  ;;  %v688_v59 = vsel %vm2401_vm11, 1.0, %v1583_v43  ;;  %v687_v1 = vsel %vm2402_vm8, 1.0, %v1583_v43 }
 0x1e4   :  { %v593_v36 = vsel %vm2048_vm2, %v1778_v11, 0.0  ;;  %vm2391_vm15 = vmmov %vm2386_vm1  ;;  %v366_v46 = vpop.permute.xlu1 %365  ;;  %620 = vadd.xlane.f32.xlu1 %v592_v51  ;;  %v1304_v51 = vadd.f32 -1.0, %v1778_v11  ;;  %v1298_v60 = vadd.f32 -1.0, %v1788_v15  ;;  %v1306_v12 = vadd.f32 -1.0, %v1792_v17 }
 0x1e5   :  { %vm2060_vm5 = vmand %vm2391_vm15, %vm285_vm12  ;;  %622 = vadd.xlane.f32.xlu0 %v593_v36  ;;  %vm386_vm1 = vcmp.eq.s32.totalorder %v366_v46, %v1706_v49  ;;  %v1301_v49 = vadd.f32 -1.0, %v1773_v9  ;;  %v1293_v9 = vadd.f32 -1.0, %v1748_v63  ;;  %v1305_v36 = vadd.f32 -1.0, %v1794_v18 }
 0x1e6   :  { %vm2067_vm10 = vmand %vm385_vm0, %vm2042_vm9  ;;  %v1296_v63 = vadd.f32 -1.0, %v1750_v0  ;;  %v686_v0 = vsel %vm2399_vm7, 1.0, %v1583_v43  ;;  %v432_v4 = vmul.f32 14.285714, %v1304_v51  ;;  %vm2403_vm0 = vnez %v2363_v52 }
 0x1e7   :  { %vm2075_vm12 = vmand %vm386_vm1, %vm2060_vm5  ;;  %v594_v55 = vsel %vm2067_vm10, %v1794_v18, 0.0  ;;  %v429_v19 = vmul.f32 14.285714, %v1301_v49  ;;  %v421_v13 = vmul.f32 14.285714, %v1293_v9  ;;  %vm2404_vm15 = vnez %v2347_v62 }
 0x1e8   :  { %v595_v54 = vsel %vm2075_vm12, %v1792_v17, 0.0  ;;  %624 = vadd.xlane.f32.xlu1 %v594_v55  ;;  %v433_v18 = vmul.f32 14.285714, %v1305_v36  ;;  %v424_v50 = vmul.f32 14.285714, %v1296_v63  ;;  %v1295_v55 = vadd.f32 -1.0, %v1755_v2 }
 0x1e9   :  { %626 = vadd.xlane.f32.xlu0 %v595_v54  ;;  %v455_v57 = vmul.f32 1.442695, %v429_v19  ;;  %v439_v46 = vmul.f32 1.442695, %v421_v13  ;;  %v461_v49 = vmul.f32 1.442695, %v432_v4  ;;  %vm2405_vm1 = vnez %v2374_v14 }
 0x1ea   :  { %v463_v39 = vmul.f32 1.442695, %v433_v18  ;;  %v1500_v11 = vpop.eup %1499  ;;  %v445_v54 = vmul.f32 1.442695, %v424_v50  ;;  %v426_v20 = vmul.f32 14.285714, %v1298_v60  ;;  %vm2406_vm3 = vnez %v2370_v16 }
 0x1eb   :  { %1505 = vpow2.f32 %v455_v57  ;;  %v434_v45 = vmul.f32 14.285714, %v1306_v12  ;;  %vm2407_vm7 = vnez %v2341_v53  ;;  %vm2410_vm11 = vnez %v2359_v37 }
 0x1ec   :  { %697 = vadd.xlane.f32.xlu1 %v679_v7  ;;  %1507 = vpow2.f32 %v459_v41  ;;  %v1502_v58 = vpop.eup %1501  ;;  %v423_v7 = vmul.f32 14.285714, %v1295_v55  ;;  %v449_v9 = vmul.f32 1.442695, %v426_v20  ;;  %v692_v37 = vsel %vm2075_vm12, 1.0, %v1583_v43 }
 0x1ed   :  { %699 = vadd.xlane.f32.xlu0 %v680_v8  ;;  %1509 = vpow2.f32 %v439_v46  ;;  %v1504_v6 = vpop.eup %1503  ;;  %v475_v8 = vsel %vm2403_vm0, %v1500_v11, 0.0  ;;  %v470_v24 = vsel %vm2404_vm15, %v1502_v58, 0.0 }
 0x1ee   :  { %1511 = vpow2.f32 %v463_v39  ;;  %v478_v15 = vsel %vm2405_vm1, %v1504_v6, 0.0  ;;  %v443_v61 = vmul.f32 1.442695, %v423_v7 }
 0x1ef   :  { %1513 = vpow2.f32 %v445_v54 }
 0x1f0   :  { %701 = vadd.xlane.f32.xlu1 %v681_v5  ;;  %1515 = vpow2.f32 %v461_v49  ;;  %v465_v5 = vmul.f32 1.442695, %v434_v45 }
 0x1f1   :  { %703 = vadd.xlane.f32.xlu0 %v682_v25  ;;  %1517 = vpow2.f32 %v443_v61 }
 0x1f2   :  { %1519 = vpow2.f32 %v449_v9 }
 0x1f3   :  { %1521 = vpow2.f32 %v465_v5 }
 0x1f4   :  { %705 = vadd.xlane.f32.xlu1 %v683_v3 }
 0x1f5   :  { %707 = vadd.xlane.f32.xlu0 %v684_v23  ;;  %v1506_v2 = vpop.eup %1505 }
 0x1f6   :  { %v477_v19 = vsel %vm2406_vm3, %v1506_v2, 0.0  ;;  %v1508_v52 = vpop.eup %1507 }
 0x1f7   :  { %v1510_v22 = vpop.eup %1509  ;;  %v479_v62 = vsel %vm2008_vm14, %v1508_v52, 0.0  ;;  %vm2409_vm14 = vnez %v2343_v56  ;;  %v690_v56 = vsel %vm2048_vm2, 1.0, %v1583_v43  ;;  %vm644_vm2 = vcmask 15368  }
 0x1f8   :  { %709 = vadd.xlane.f32.xlu1 %v685_v44  ;;  %v1512_v25 = vpop.eup %1511  ;;  %v469_v17 = vsel %vm2407_vm7, %v1510_v22, 0.0 }
 0x1f9   :  { %711 = vadd.xlane.f32.xlu0 %v686_v0  ;;  %v1514_v14 = vpop.eup %1513  ;;  %v481_v16 = vsel %vm2042_vm9, %v1512_v25, 0.0 }
 0x1fa   :  { %v1516_v57 = vpop.eup %1515  ;;  %v472_v30 = vsel %vm2408_vm13, %v1514_v14, 0.0 }
 0x1fb   :  { %v480_v21 = vsel %vm2027_vm4, %v1516_v57, 0.0  ;;  %v1518_v53 = vpop.eup %1517  ;;  %vm547_vm4 = vcmask 7168  }
 0x1fc   :  { %713 = vadd.xlane.f32.xlu1 %v687_v1  ;;  %v1520_v36 = vpop.eup %1519  ;;  %v471_v13 = vsel %vm2409_vm14, %v1518_v53, 0.0 }
 0x1fd   :  { %715 = vadd.xlane.f32.xlu0 %v688_v59  ;;  %v474_v33 = vsel %vm2410_vm11, %v1520_v36, 0.0  ;;  %v1522_v63 = vpop.eup %1521 }
 0x1fe   :  { %v482_v10 = vsel %vm2060_vm5, %v1522_v63, 0.0  ;;  %vm741_vm5 = vcmask 23568  }
 0x200   :  { %505 = vadd.xlane.f32.xlu1 %v470_v24 }
 0x201   :  { %515 = vadd.xlane.f32.xlu0 %v475_v8 }
 0x204   :  { %519 = vadd.xlane.f32.xlu1 %v477_v19 }
 0x205   :  { %521 = vadd.xlane.f32.xlu0 %v478_v15 }
 0x208   :  { %523 = vadd.xlane.f32.xlu1 %v479_v62 }
 0x209   :  { %503 = vadd.xlane.f32.xlu0 %v469_v17 }
 0x20c   :  { %527 = vadd.xlane.f32.xlu1 %v481_v16 }
 0x20d   :  { %509 = vadd.xlane.f32.xlu0 %v472_v30 }
 0x211   :  { %525 = vadd.xlane.f32.xlu0 %v480_v21 }
 0x215   :  { %507 = vadd.xlane.f32.xlu0 %v471_v13 }
 0x219   :  { %513 = vadd.xlane.f32.xlu0 %v474_v33 }
 0x21d   :  { %529 = vadd.xlane.f32.xlu0 %v482_v10 }
 0x221   :  { %511 = vadd.xlane.f32.xlu0 %v473_v29 }
 0x225   :  { %719 = vadd.xlane.f32.xlu0 %v690_v56 }
 0x229   :  { %723 = vadd.xlane.f32.xlu0 %v692_v37 }
 0x255   :  { %v2159_v26 = vpop.xlane.xlu1 %600 }
 0x259   :  { %v2161_v38 = vpop.xlane.xlu0 %602  ;;  %v2163_v23 = vpop.xlane.xlu1 %604 }
 0x25d   :  { %v2165_v28 = vpop.xlane.xlu0 %606  ;;  %v502_v27 = vpop.xlane.xlu1 %501 }
 0x25e   :  { %549 = vst.msk [vmem:[#allocation2 + $0x8] sm:$0xff] %vm547_vm4, %v502_v27 }
 0x261   :  { %v518_v29 = vpop.xlane.xlu0 %517  ;;  %v500_v34 = vpop.xlane.xlu1 %499 }
 0x262   :  { %557 = vst.msk [vmem:[#allocation2 + $0x48] sm:$0xff] %vm547_vm4, %v518_v29  ;;  %548 = vst.msk [vmem:[#allocation2] sm:$0xff] %vm547_vm4, %v500_v34 }
 0x265   :  { %v2170_v48 = vpop.xlane.xlu0 %610  ;;  %v2172_v3 = vpop.xlane.xlu1 %608  ;;  %v565_v51 = vld [vmem:[#allocation2 + $0x8] sm:$0xff] }
 0x266   :  { %v629_v41 = vadd.f32 %v1823_v31, %v565_v51 }
 0x268   :  { %646 = vst.msk [vmem:[#allocation2 + $0x8] sm:$0xff] %vm644_vm2, %v629_v41 }
 0x269   :  { %v615_v18 = vpop.xlane.xlu0 %614  ;;  %v2175_v46 = vpop.xlane.xlu1 %612  ;;  %v564_v50 = vld [vmem:[#allocation2] sm:$0xff]  ;;  %v573_v0 = vld [vmem:[#allocation2 + $0x48] sm:$0xff] }
 0x26a   :  { %v628_v44 = vadd.f32 %v1830_v40, %v564_v50  ;;  %v637_v4 = vadd.f32 %v615_v18, %v573_v0 }
 0x26c   :  { %645 = vst.msk [vmem:[#allocation2] sm:$0xff] %vm644_vm2, %v628_v44  ;;  %654 = vst.msk [vmem:[#allocation2 + $0x48] sm:$0xff] %vm644_vm2, %v637_v4 }
 0x26d   :  { %v2179_v39 = vpop.xlane.xlu0 %618  ;;  %v2181_v11 = vpop.xlane.xlu1 %616 }
 0x26f   :  { %v662_v31 = vld [vmem:[#allocation2 + $0x8] sm:$0xff] }
 0x270   :  { %v726_v59 = vadd.f32 %v1833_v42, %v662_v31 }
 0x271   :  { %v2187_v55 = vpop.xlane.xlu1 %620 }
 0x272   :  { %v2185_v54 = vpop.xlane.xlu0 %622  ;;  %743 = vst.msk [vmem:[#allocation2 + $0x8] sm:$0xff] %vm741_vm5, %v726_v59 }
 0x273   :  { %v661_v40 = vld [vmem:[#allocation2] sm:$0xff]  ;;  %v670_v19 = vld [vmem:[#allocation2 + $0x48] sm:$0xff] }
 0x274   :  { %v725_v49 = vadd.f32 %v1827_v35, %v661_v40 }
 0x275   :  { %v2193_v58 = vpop.xlane.xlu1 %624 }
 0x276   :  { %v2191_v1 = vpop.xlane.xlu0 %626  ;;  %742 = vst.msk [vmem:[#allocation2] sm:$0xff] %vm741_vm5, %v725_v49 }
 0x279   :  { %v2199_v6 = vpop.xlane.xlu1 %697  ;;  %v2201_v8 = vld [vmem:[#allocation2 + $0x8] sm:$0xff] }
 0x27a   :  { %v2197_v60 = vpop.xlane.xlu0 %699  ;;  %vm778_vm12 = vcmp.lt.f32.partialorder %v2201_v8, 1e-06  ;;  %1523 = vlog2.f32 %v2201_v8  ;;  %v858_v47 = vmul.f32 14.285714, %v2201_v8 }
 0x27b   :  { %v794_v7 = vsel %vm778_vm12, 1.0, %v2201_v8 }
 0x27c   :  { %1051 = vrot.lane.b32.xlu1 %v794_v7, %s1584_s2 }
 0x27d   :  { %v2207_v2 = vpop.xlane.xlu1 %701  ;;  %v2211_v35 = vld [vmem:[#allocation2] sm:$0xff] }
 0x27e   :  { %v2205_v42 = vpop.xlane.xlu0 %703  ;;  %vm777_vm8 = vcmp.lt.f32.partialorder %v2211_v35, 1e-06  ;;  %1525 = vlog2.f32 %v2211_v35 }
 0x27f   :  { %v793_v12 = vsel %vm777_vm8, 1.0, %v2211_v35 }
 0x280   :  { %1049 = vrot.lane.b32.xlu1 %v793_v12, %s1584_s2 }
 0x281   :  { %v2217_v20 = vpop.xlane.xlu1 %705 }
 0x282   :  { %v2215_v24 = vpop.xlane.xlu0 %707 }
 0x284   :  { %v1524_v61 = vpop.eup %1523 }
 0x285   :  { %v710_v52 = vpop.xlane.xlu1 %709  ;;  %v812_v9 = vmul.f32 0.6931472, %v1524_v61 }
 0x286   :  { %v712_v15 = vpop.xlane.xlu0 %711 }
 0x287   :  { %v734_v22 = vadd.f32 %v712_v15, %v670_v19  ;;  %v842_v25 = vadd.f32 14.285714, %v812_v9 }
 0x288   :  { %v1526_v17 = vpop.eup %1525 }
 0x289   :  { %751 = vst.msk [vmem:[#allocation2 + $0x48] sm:$0xff] %vm741_vm5, %v734_v22  ;;  %v714_v62 = vpop.xlane.xlu1 %713  ;;  %891 = vrot.lane.b32.xlu1 %v842_v25, %s1585_s14  ;;  %v810_v14 = vmul.f32 0.6931472, %v1526_v17 }
 0x28a   :  { %v716_v45 = vpop.xlane.xlu0 %715 }
 0x28b   :  { %v841_v57 = vadd.f32 14.285714, %v810_v14  ;;  %v689_v14 = vsel %vm2033_vm6, 1.0, %v1583_v43 }
 0x28d   :  { %v506_v16 = vpop.xlane.xlu1 %505  ;;  %889 = vrot.lane.b32.xlu1 %v841_v57, %s1585_s14 }
 0x28e   :  { %v516_v5 = vpop.xlane.xlu0 %515  ;;  %551 = vst.msk [vmem:[#allocation2 + $0x18] sm:$0xff] %vm547_vm4, %v506_v16 }
 0x28f   :  { %556 = vst.msk [vmem:[#allocation2 + $0x40] sm:$0xff] %vm547_vm4, %v516_v5 }
 0x291   :  { %v520_v21 = vpop.xlane.xlu1 %519 }
 0x292   :  { %v522_v30 = vpop.xlane.xlu0 %521  ;;  %558 = vst.msk [vmem:[#allocation2 + $0x50] sm:$0xff] %vm547_vm4, %v520_v21 }
 0x293   :  { %559 = vst.msk [vmem:[#allocation2 + $0x58] sm:$0xff] %vm547_vm4, %v522_v30 }
 0x295   :  { %v524_v36 = vpop.xlane.xlu1 %523  ;;  %v567_v33 = vld [vmem:[#allocation2 + $0x18] sm:$0xff] }
 0x296   :  { %v504_v53 = vpop.xlane.xlu0 %503  ;;  %v572_v13 = vld [vmem:[#allocation2 + $0x40] sm:$0xff]  ;;  %v631_v10 = vadd.f32 %v2161_v38, %v567_v33  ;;  %560 = vst.msk [vmem:[#allocation2 + $0x60] sm:$0xff] %vm547_vm4, %v524_v36  ;;  %v1586_v33 = vmov 1  }
 0x297   :  { %v636_v63 = vadd.f32 %v2175_v46, %v572_v13  ;;  %550 = vst.msk [vmem:[#allocation2 + $0x10] sm:$0xff] %vm547_vm4, %v504_v53  ;;  %1455 = vset.pattern.permute.xlu1 %v1586_v33  ;;  %1454 = vset.pattern.permute.xlu0 %v1586_v33 }
 0x298   :  { %648 = vst.msk [vmem:[#allocation2 + $0x18] sm:$0xff] %vm644_vm2, %v631_v10 }
 0x299   :  { %v528_v37 = vpop.xlane.xlu1 %527  ;;  %653 = vst.msk [vmem:[#allocation2 + $0x40] sm:$0xff] %vm644_vm2, %v636_v63  ;;  %v574_v29 = vld [vmem:[#allocation2 + $0x50] sm:$0xff] }
 0x29a   :  { %v510_v56 = vpop.xlane.xlu0 %509  ;;  %v575_v27 = vld [vmem:[#allocation2 + $0x58] sm:$0xff]  ;;  %v638_v51 = vadd.f32 %v2181_v11, %v574_v29  ;;  %562 = vst.msk [vmem:[#allocation2 + $0x70] sm:$0xff] %vm547_vm4, %v528_v37 }
 0x29b   :  { %v639_v34 = vadd.f32 %v2179_v39, %v575_v27  ;;  %553 = vst.msk [vmem:[#allocation2 + $0x28] sm:$0xff] %vm547_vm4, %v510_v56 }
 0x29c   :  { %655 = vst.msk [vmem:[#allocation2 + $0x50] sm:$0xff] %vm644_vm2, %v638_v51 }
 0x29d   :  { %656 = vst.msk [vmem:[#allocation2 + $0x58] sm:$0xff] %vm644_vm2, %v639_v34  ;;  %v576_v18 = vld [vmem:[#allocation2 + $0x60] sm:$0xff] }
 0x29e   :  { %v526_v38 = vpop.xlane.xlu0 %525  ;;  %v566_v41 = vld [vmem:[#allocation2 + $0x10] sm:$0xff]  ;;  %v640_v50 = vadd.f32 %v2187_v55, %v576_v18 }
 0x29f   :  { %v630_v46 = vadd.f32 %v2159_v26, %v566_v41  ;;  %561 = vst.msk [vmem:[#allocation2 + $0x68] sm:$0xff] %vm547_vm4, %v526_v38  ;;  %v664_v44 = vld [vmem:[#allocation2 + $0x18] sm:$0xff] }
 0x2a0   :  { %v669_v0 = vld [vmem:[#allocation2 + $0x40] sm:$0xff]  ;;  %v728_v11 = vadd.f32 %v2197_v60, %v664_v44  ;;  %657 = vst.msk [vmem:[#allocation2 + $0x60] sm:$0xff] %vm644_vm2, %v640_v50 }
 0x2a1   :  { %v733_v39 = vadd.f32 %v710_v52, %v669_v0  ;;  %647 = vst.msk [vmem:[#allocation2 + $0x10] sm:$0xff] %vm644_vm2, %v630_v46  ;;  %v578_v59 = vld [vmem:[#allocation2 + $0x70] sm:$0xff]  ;;  %v857_v46 = vmul.f32 14.285714, %v2211_v35 }
 0x2a2   :  { %v508_v4 = vpop.xlane.xlu0 %507  ;;  %v569_v31 = vld [vmem:[#allocation2 + $0x28] sm:$0xff]  ;;  %745 = vst.msk [vmem:[#allocation2 + $0x18] sm:$0xff] %vm741_vm5, %v728_v11  ;;  %v642_v55 = vadd.f32 %v2193_v58, %v578_v59 }
 0x2a3   :  { %750 = vst.msk [vmem:[#allocation2 + $0x40] sm:$0xff] %vm741_vm5, %v733_v39  ;;  %v633_v26 = vadd.f32 %v2165_v28, %v569_v31  ;;  %v671_v49 = vld [vmem:[#allocation2 + $0x50] sm:$0xff] }
 0x2a4   :  { %552 = vst.msk [vmem:[#allocation2 + $0x20] sm:$0xff] %vm547_vm4, %v508_v4  ;;  %v672_v40 = vld [vmem:[#allocation2 + $0x58] sm:$0xff]  ;;  %v735_v12 = vadd.f32 %v714_v62, %v671_v49 }
 0x2a5   :  { %v736_v60 = vadd.f32 %v716_v45, %v672_v40  ;;  %650 = vst.msk [vmem:[#allocation2 + $0x28] sm:$0xff] %vm644_vm2, %v633_v26  ;;  %659 = vst.msk [vmem:[#allocation2 + $0x70] sm:$0xff] %vm644_vm2, %v642_v55 }
 0x2a6   :  { %v514_v7 = vpop.xlane.xlu0 %513  ;;  %v577_v15 = vld [vmem:[#allocation2 + $0x68] sm:$0xff]  ;;  %752 = vst.msk [vmem:[#allocation2 + $0x50] sm:$0xff] %vm741_vm5, %v735_v12 }
 0x2a7   :  { %753 = vst.msk [vmem:[#allocation2 + $0x58] sm:$0xff] %vm741_vm5, %v736_v60  ;;  %v641_v28 = vadd.f32 %v2185_v54, %v577_v15  ;;  %v673_v27 = vld [vmem:[#allocation2 + $0x60] sm:$0xff] }
 0x2a8   :  { %555 = vst.msk [vmem:[#allocation2 + $0x38] sm:$0xff] %vm547_vm4, %v514_v7  ;;  %v663_v19 = vld [vmem:[#allocation2 + $0x10] sm:$0xff] }
 0x2a9   :  { %v727_v52 = vadd.f32 %v2199_v6, %v663_v19  ;;  %658 = vst.msk [vmem:[#allocation2 + $0x68] sm:$0xff] %vm644_vm2, %v641_v28 }
 0x2aa   :  { %v530_v58 = vpop.xlane.xlu0 %529 }
 0x2ab   :  { %v568_v61 = vld [vmem:[#allocation2 + $0x20] sm:$0xff]  ;;  %744 = vst.msk [vmem:[#allocation2 + $0x10] sm:$0xff] %vm741_vm5, %v727_v52 }
 0x2ac   :  { %v632_v22 = vadd.f32 %v2163_v23, %v568_v61  ;;  %563 = vst.msk [vmem:[#allocation2 + $0x78] sm:$0xff] %vm547_vm4, %v530_v58  ;;  %v666_v9 = vld [vmem:[#allocation2 + $0x28] sm:$0xff]  ;;  %v675_v31 = vld [vmem:[#allocation2 + $0x70] sm:$0xff] }
 0x2ad   :  { %v730_v62 = vadd.f32 %v2205_v42, %v666_v9 }
 0x2ae   :  { %v512_v45 = vpop.xlane.xlu0 %511  ;;  %649 = vst.msk [vmem:[#allocation2 + $0x20] sm:$0xff] %vm644_vm2, %v632_v22 }
 0x2af   :  { %v571_v54 = vld [vmem:[#allocation2 + $0x38] sm:$0xff]  ;;  %747 = vst.msk [vmem:[#allocation2 + $0x28] sm:$0xff] %vm741_vm5, %v730_v62 }
 0x2b0   :  { %v635_v6 = vadd.f32 %v2170_v48, %v571_v54  ;;  %554 = vst.msk [vmem:[#allocation2 + $0x30] sm:$0xff] %vm547_vm4, %v512_v45  ;;  %v674_v17 = vld [vmem:[#allocation2 + $0x68] sm:$0xff] }
 0x2b1   :  { %717 = vadd.xlane.f32.xlu1 %v689_v14 }
 0x2b2   :  { %v720_v25 = vpop.xlane.xlu0 %719  ;;  %652 = vst.msk [vmem:[#allocation2 + $0x38] sm:$0xff] %vm644_vm2, %v635_v6 }
 0x2b3   :  { %v738_v23 = vadd.f32 %v720_v25, %v674_v17  ;;  %v579_v42 = vld [vmem:[#allocation2 + $0x78] sm:$0xff] }
 0x2b4   :  { %v643_v5 = vadd.f32 %v2191_v1, %v579_v42 }
 0x2b5   :  { %755 = vst.msk [vmem:[#allocation2 + $0x68] sm:$0xff] %vm741_vm5, %v738_v23  ;;  %v665_v16 = vld [vmem:[#allocation2 + $0x20] sm:$0xff] }
 0x2b6   :  { %v729_v48 = vadd.f32 %v2207_v2, %v665_v16  ;;  %660 = vst.msk [vmem:[#allocation2 + $0x78] sm:$0xff] %vm644_vm2, %v643_v5  ;;  %v724_v53 = vpop.xlane.xlu0 %723 }
 0x2b7   :  { %v570_v57 = vld [vmem:[#allocation2 + $0x30] sm:$0xff] }
 0x2b8   :  { %746 = vst.msk [vmem:[#allocation2 + $0x20] sm:$0xff] %vm741_vm5, %v729_v48  ;;  %v634_v30 = vadd.f32 %v2172_v3, %v570_v57 }
 0x2b9   :  { %v668_v21 = vld [vmem:[#allocation2 + $0x38] sm:$0xff] }
 0x2ba   :  { %v732_v32 = vadd.f32 %v2215_v24, %v668_v21  ;;  %651 = vst.msk [vmem:[#allocation2 + $0x30] sm:$0xff] %vm644_vm2, %v634_v30 }
 0x2bc   :  { %749 = vst.msk [vmem:[#allocation2 + $0x38] sm:$0xff] %vm741_vm5, %v732_v32 }
 0x2bd   :  { %v676_v36 = vld [vmem:[#allocation2 + $0x78] sm:$0xff] }
 0x2be   :  { %v740_v1 = vadd.f32 %v724_v53, %v676_v36 }
 0x2c0   :  { %757 = vst.msk [vmem:[#allocation2 + $0x78] sm:$0xff] %vm741_vm5, %v740_v1 }
 0x2c1   :  { %v667_v2 = vld [vmem:[#allocation2 + $0x30] sm:$0xff] }
 0x2c2   :  { %v731_v13 = vadd.f32 %v2217_v20, %v667_v2  ;;  %v691_v20 = vsel %vm2067_vm10, 1.0, %v1583_v43 }
 0x2c4   :  { %748 = vst.msk [vmem:[#allocation2 + $0x30] sm:$0xff] %vm741_vm5, %v731_v13 }
 0x2ee   :  { %v1052_v3 = vpop.permute.xlu1 %1051 }
 0x2ef   :  { %1527 = vrcp.f32 %v1052_v3 }
 0x2f2   :  { %v1050_v63 = vpop.permute.xlu1 %1049 }
 0x2f3   :  { %1529 = vrcp.f32 %v1050_v63 }
 0x2f9   :  { %v1528_v41 = vpop.eup %1527 }
 0x2fb   :  { %v892_v24 = vpop.permute.xlu1 %891 }
 0x2fc   :  { %v938_v10 = vmul.f32 %v892_v24, %v2201_v8 }
 0x2fd   :  { %v1530_v4 = vpop.eup %1529 }
 0x2fe   :  { %971 = vrot.lane.b32.xlu1 %v938_v10, %s1584_s2 }
 0x2ff   :  { %v890_v56 = vpop.permute.xlu1 %889 }
 0x300   :  { %v937_v37 = vmul.f32 %v890_v56, %v2211_v35 }
 0x302   :  { %969 = vrot.lane.b32.xlu1 %v937_v37, %s1584_s2 }
 0x326   :  { %721 = vadd.xlane.f32.xlu1 %v691_v20 }
 0x337   :  { %1457 = vperm.xlu1 %1455, %v1583_v43  }
 0x33b   :  { %1462 = vperm.xlu1 %1455, %v1583_v43  }
 0x33e   :  { %v718_v29 = vpop.xlane.xlu1 %717 }
 0x33f   :  { %v737_v34 = vadd.f32 %v718_v29, %v673_v27  ;;  %1467 = vperm.xlu1 %1455, %v1583_v43  }
 0x341   :  { %754 = vst.msk [vmem:[#allocation2 + $0x60] sm:$0xff] %vm741_vm5, %v737_v34 }
 0x343   :  { %1472 = vperm.xlu1 %1455, %v1583_v43  }
 0x347   :  { %1477 = vperm.xlu1 %1455, %v1583_v43  }
 0x34b   :  { %1482 = vperm.xlu1 %1455, %v1583_v43  }
 0x370   :  { %v972_v51 = vpop.permute.xlu1 %971 }
 0x371   :  { %v1018_v38 = vsub.f32 %v858_v47, %v972_v51 }
 0x373   :  { %v1100_v18 = vmul.f32 %v1528_v41, %v1018_v38 }
 0x374   :  { %v970_v50 = vpop.permute.xlu1 %969 }
 0x375   :  { %v1130_v0 = vmul.f32 -1.0, %v1100_v18  ;;  %v1017_v44 = vsub.f32 %v857_v46, %v970_v50 }
 0x377   :  { %v1098_v39 = vmul.f32 %v1530_v4, %v1017_v44  ;;  %1184 = vperm.xlu0 %1454, %v1130_v0  }
 0x379   :  { %v1129_v11 = vmul.f32 -1.0, %v1098_v39 }
 0x37b   :  { %1179 = vperm.xlu1 %1455, %v1129_v11  }
 0x37f   :  { %1487 = vperm.xlu1 %1455, %v1583_v43  }
 0x3b3   :  { %v722_v59 = vpop.xlane.xlu1 %721 }
 0x3b4   :  { %v739_v26 = vadd.f32 %v722_v59, %v675_v31 }
 0x3b6   :  { %756 = vst.msk [vmem:[#allocation2 + $0x70] sm:$0xff] %vm741_vm5, %v739_v26 }
 0x3b7   :  { %v1458_v8 = vpop.permute.xlu1 %1457 }
 0x3b8   :  { %v1460_v55 = vunpack.i.h.bf16 %v1458_v8  ;;  %v1459_v40 = vunpack.i.l.bf16 %v1458_v8 }
 0x3ba   :  { %1260 = vst [vmem:[#allocation6 + $0x18] sm:$0xff] %v1460_v55  ;;  %1259 = vst [vmem:[#allocation6 + $0x10] sm:$0xff] %v1459_v40 }
 0x3bb   :  { %v1463_v35 = vpop.permute.xlu1 %1462 }
 0x3bc   :  { %v1465_v49 = vunpack.i.h.bf16 %v1463_v35  ;;  %v1464_v7 = vunpack.i.l.bf16 %v1463_v35 }
 0x3be   :  { %1262 = vst [vmem:[#allocation6 + $0x28] sm:$0xff] %v1465_v49  ;;  %1261 = vst [vmem:[#allocation6 + $0x20] sm:$0xff] %v1464_v7 }
 0x3bf   :  { %v1468_v60 = vpop.permute.xlu1 %1467 }
 0x3c0   :  { %v1470_v12 = vunpack.i.h.bf16 %v1468_v60  ;;  %v1469_v15 = vunpack.i.l.bf16 %v1468_v60 }
 0x3c2   :  { %1264 = vst [vmem:[#allocation6 + $0x38] sm:$0xff] %v1470_v12  ;;  %1263 = vst [vmem:[#allocation6 + $0x30] sm:$0xff] %v1469_v15 }
 0x3c3   :  { %v1473_v43 = vpop.permute.xlu1 %1472 }
 0x3c4   :  { %v1475_v28 = vunpack.i.h.bf16 %v1473_v43  ;;  %v1474_v19 = vunpack.i.l.bf16 %v1473_v43 }
 0x3c6   :  { %1266 = vst [vmem:[#allocation6 + $0x48] sm:$0xff] %v1475_v28  ;;  %1265 = vst [vmem:[#allocation6 + $0x40] sm:$0xff] %v1474_v19 }
 0x3c7   :  { %v1478_v58 = vpop.permute.xlu1 %1477 }
 0x3c8   :  { %v1480_v52 = vunpack.i.h.bf16 %v1478_v58  ;;  %v1479_v61 = vunpack.i.l.bf16 %v1478_v58 }
 0x3ca   :  { %1268 = vst [vmem:[#allocation6 + $0x58] sm:$0xff] %v1480_v52  ;;  %1267 = vst [vmem:[#allocation6 + $0x50] sm:$0xff] %v1479_v61 }
 0x3cb   :  { %v1483_v22 = vpop.permute.xlu1 %1482 }
 0x3cc   :  { %v1485_v9 = vunpack.i.h.bf16 %v1483_v22  ;;  %v1484_v45 = vunpack.i.l.bf16 %v1483_v22 }
 0x3ce   :  { %1270 = vst [vmem:[#allocation6 + $0x68] sm:$0xff] %v1485_v9  ;;  %1269 = vst [vmem:[#allocation6 + $0x60] sm:$0xff] %v1484_v45 }
 0x3f6   :  { %v1185_v62 = vpop.permute.xlu0 %1184 }
 0x3f7   :  { %1258 = vst [vmem:[#allocation6 + $0x8] sm:$0xff] %v1185_v62 }
 0x3fa   :  { %v1180_v54 = vpop.permute.xlu1 %1179 }
 0x3fb   :  { %1257 = vst [vmem:[#allocation6] sm:$0xff] %v1180_v54 }
 0x3fe   :  { %v1488_v6 = vpop.permute.xlu1 %1487 }
 0x3ff   :  { %v1490_v25 = vunpack.i.h.bf16 %v1488_v6  ;;  %v1489_v17 = vunpack.i.l.bf16 %v1488_v6 }
 0x401   :  { %1272 = vst [vmem:[#allocation6 + $0x78] sm:$0xff] %v1490_v25  ;;  %1271 = vst [vmem:[#allocation6 + $0x70] sm:$0xff] %v1489_v17 }
 0x402   :  { %1564 = shalt.err (!%p1561_p12)
}
 0x403   :  { %s1565_s20 = scalar_lea.hbm %s2318_s4, 2048 }
 0x404   :  { %p1566_p13 = scmp.ne.s32.totalorder %s2318_s4, %s1565_s20  ;;  %p1569_p0 = scmp.lt.u32.totalorder %s1565_s20, %s2318_s4 }
 0x406   :  { %p1571_p1 = pnand %p1569_p0, %p1566_p13 }
 0x408   :  { %1574 = shalt.err (!%p1571_p1)
}
 0x409   :  { %1284 = dma.vmem_to_hbm [thread:$0]  %s1279_s16, 2048, %s2318_s4, [#allocation5], %s1580_s25, %s1580_s25, %s1581_s26  }
 0x40a   :  { %1577 = dma.done.wait [#allocation5], 2048  }
 0x40b   :  { %1578 = vsyncadd [#allocation5], 4294965248 }
 0x40c   :  { %1288 = vsyncpa [#allocation4], 1 }
 0x40d   :  { %1289 = vsyncpa [#allocation5], 1 }

</bundles_post_ra>
